<compile_context>
chip_gen: v7x
topology: tpu7x:2x2x1
jax: 0.10.0
libtpu: 0.0.40
codegen_flags: <defaults>
</compile_context>

<pallas_src>
import functools

import jax
import jax.numpy as jnp
from jax.experimental import pallas as pl
from jax.experimental.pallas import tpu as pltpu


def _hct_loss_kernel(x_ref, t_ref, c_ref, hinge_ref, valid_ref, *, margin, bf16_matmul):
    x = x_ref[...]                         # (B, D)  f32, resident across tiles
    c = c_ref[...]                         # (TC, D) f32, current class tile
    t = t_ref[...]                         # (B, 1)  int32 labels

    B = x.shape[0]
    TC = c.shape[0]

    # Squared euclidean distance tile, kept in (B, TC) layout:
    #   dist[b, k] = ||x_b||^2 + ||c_k||^2 - 2 <x_b, c_k>
    xsq = jnp.sum(x * x, axis=1, keepdims=True)            # (B, 1)
    csq = jnp.sum(c * c, axis=1, keepdims=True)            # (TC, 1)  (tiny relayout below)
    dn = (((1,), (1,)), ((), ()))                          # contract D with D (NT matmul)
    if bf16_matmul:
        cross = jax.lax.dot_general(
            x.astype(jnp.bfloat16), c.astype(jnp.bfloat16),
            dimension_numbers=dn, preferred_element_type=jnp.float32)
    else:
        cross = jax.lax.dot_general(
            x, c, dimension_numbers=dn, preferred_element_type=jnp.float32)  # (B, TC) MXU
    dist = xsq + csq.T - 2.0 * cross
    dist = jnp.clip(dist, 1e-12, 1e12)                     # same clamp as the torch reference

    # mask[b, k] = (targets[b] == global class id of column k).
    tile_off = pl.program_id(0) * TC
    class_ids = tile_off + jax.lax.broadcasted_iota(jnp.int32, (B, TC), 1)
    mask = class_ids == t                                  # (B, TC) bool

    counts = jnp.sum(mask.astype(jnp.int32), axis=0, keepdims=True)   # (1, TC) int32
    valid = counts == 4                                                # exactly-4-sample classes

    neg_big = jnp.float32(-3.0e38)
    pos_big = jnp.float32(3.0e38)
    # hardest positive: max distance of own samples to their center
    dist_ap = jnp.max(jnp.where(mask, dist, neg_big), axis=0, keepdims=True)   # (1, TC)
    # hardest negative: min distance of other samples to this center
    dist_an = jnp.min(jnp.where(mask, pos_big, dist), axis=0, keepdims=True)   # (1, TC)

    # MarginRankingLoss(dist_an, dist_ap, y=1) contribution per class.
    hinge = jnp.maximum(dist_ap - dist_an + jnp.float32(margin), 0.0)
    hinge_ref[...] = jnp.where(valid, hinge, 0.0)
    valid_ref[...] = valid.astype(jnp.float32)


def hct_loss(inputs, centers, targets, margin, *, class_tile=512, bf16_matmul=False):
    """inputs: (B, D), centers: (C, D), targets: (B,) int -> scalar f32 loss."""
    inputs = inputs.astype(jnp.float32)
    centers = centers.astype(jnp.float32)
    B, D = inputs.shape
    C = centers.shape[0]
    t2d = targets.reshape(B, 1).astype(jnp.int32)

    if C <= class_tile:
        # Single tile: full-extent blocks, no padding needed.
        tc = C
        num_tiles = 1
        c_pad = centers
    else:
        tc = class_tile
        assert tc % 128 == 0, "class_tile must be a multiple of 128"
        c_rows = pl.cdiv(C, tc) * tc
        pad = c_rows - C
        c_pad = jnp.pad(centers, ((0, pad), (0, 0))) if pad else centers
        num_tiles = c_rows // tc
    c_total = num_tiles * tc

    # Explicit VMEM budget (double-buffered streams + (B, TC) temporaries + headroom),
    # clamped below v7x's 64 MiB physical VMEM.
    itemsize = 4
    est = (
        2 * B * D * itemsize          # resident features
        + 2 * B * itemsize            # resident targets
        + 2 * tc * D * itemsize       # centers tile, double-buffered
        + 4 * tc * itemsize           # two (1, tc) outputs, double-buffered
        + 6 * B * tc * itemsize       # dist / mask / where temporaries
        + (2 << 20)                   # headroom
    )
    vmem_bytes = int(min(max(est, 4 << 20), 64 << 20))

    kernel = functools.partial(
        _hct_loss_kernel, margin=float(margin), bf16_matmul=bf16_matmul)

    hinge, valid = pl.pallas_call(
        kernel,
        out_shape=(
            jax.ShapeDtypeStruct((1, c_total), jnp.float32),
            jax.ShapeDtypeStruct((1, c_total), jnp.float32),
        ),
        grid=(num_tiles,),
        in_specs=[
            pl.BlockSpec((B, D), lambda i: (0, 0)),    # features: resident across tiles
            pl.BlockSpec((B, 1), lambda i: (0, 0)),    # targets:  resident across tiles
            pl.BlockSpec((tc, D), lambda i: (i, 0)),   # centers:  streamed per class tile
        ],
        out_specs=(
            pl.BlockSpec((1, tc), lambda i: (0, i)),   # per-class hinge (lane-dense)
            pl.BlockSpec((1, tc), lambda i: (0, i)),   # per-class validity (lane-dense)
        ),
        compiler_params=pltpu.CompilerParams(
            dimension_semantics=("parallel",),         # class tiles independent -> 2 TCs on v7x
            vmem_limit_bytes=vmem_bytes,
        ),
    )(inputs, t2d, c_pad)

    # Tiny epilogue reduce (padded classes contribute zero to both terms).
    # NOTE: like the reference, this is undefined (NaN here, error in torch) when no
    # class has exactly 4 samples in the batch.
    return jnp.sum(hinge) / jnp.sum(valid)


def hct_loss_ref(inputs, centers, targets, margin):
    """Pure-JAX reference mirroring the PyTorch forward."""
    C = centers.shape[0]
    dist = (
        jnp.sum(inputs**2, axis=1, keepdims=True)
        + jnp.sum(centers**2, axis=1, keepdims=True).T
        - 2.0 * inputs @ centers.T
    )
    dist = jnp.clip(dist, 1e-12, 1e12)
    mask = targets[:, None] == jnp.arange(C)[None, :]
    distnew, masknew = dist.T, mask.T
    counts = masknew.sum(axis=1)
    valid = counts == 4
    ap = jnp.max(jnp.where(masknew, distnew, -jnp.inf), axis=1)
    an = jnp.min(jnp.where(masknew, jnp.inf, distnew), axis=1)
    per = jnp.maximum(ap - an + margin, 0.0)
    return jnp.sum(jnp.where(valid, per, 0.0)) / jnp.sum(valid)


if __name__ == "__main__":
    margin = 0.3
    key = jax.random.PRNGKey(0)

    # --- Test 1: module-sized shapes (single class tile, full-extent blocks) ---
    num_classes, feat_dim, batch = 8, 32, 8
    k_in, k_cent, key = jax.random.split(key, 3)
    inputs = jax.random.normal(k_in, (batch, feat_dim), dtype=jnp.float32)
    centers = jax.random.normal(k_cent, (num_classes, feat_dim), dtype=jnp.float32)
    targets = jnp.array([0, 0, 0, 0, 1, 1, 1, 1], dtype=jnp.int32)  # 2 ids x 4 instances

    loss = jax.block_until_ready(hct_loss(inputs, centers, targets, margin))
    ref = jax.block_until_ready(hct_loss_ref(inputs, centers, targets, margin))
    assert jnp.allclose(loss, ref, rtol=1e-4, atol=1e-4), (loss, ref)

    # --- Test 2: multi-tile class grid with padding + invalid classes ---
    num_classes2, feat_dim2 = 300, 64
    k_in2, k_cent2, key = jax.random.split(key, 3)
    targets2 = jnp.concatenate([
        jnp.repeat(jnp.array([3, 37, 74, 111, 150, 199, 256, 299], dtype=jnp.int32), 4),
        jnp.array([3, 5, 5, 200], dtype=jnp.int32),   # classes without exactly 4 samples
    ])
    batch2 = targets2.shape[0]
    inputs2 = jax.random.normal(k_in2, (batch2, feat_dim2), dtype=jnp.float32)
    centers2 = jax.random.normal(k_cent2, (num_classes2, feat_dim2), dtype=jnp.float32)

    loss2 = jax.block_until_ready(
        hct_loss(inputs2, centers2, targets2, margin, class_tile=128))
    ref2 = jax.block_until_ready(hct_loss_ref(inputs2, centers2, targets2, margin))
    assert jnp.allclose(loss2, ref2, rtol=1e-4, atol=1e-4), (loss2, ref2)

    print("KERNEL_OK")
</pallas_src>

<mosaic_0001>
module attributes {stable_mosaic.version = 11 : i64} {
  func.func @_hct_loss_kernel(%arg0: i32, %arg1: memref<8x32xf32, #tpu.memory_space<vmem>>, %arg2: memref<8x1xi32, #tpu.memory_space<vmem>>, %arg3: memref<8x32xf32, #tpu.memory_space<vmem>>, %arg4: memref<1x8xf32, #tpu.memory_space<vmem>>, %arg5: memref<1x8xf32, #tpu.memory_space<vmem>>) attributes {dimension_semantics = [#tpu.dimension_semantics<parallel>], iteration_bounds = array<i64: 1>, scalar_prefetch = 0 : i64, scratch_operands = 0 : i64, tpu.core_type = #tpu.core_type<tc>, window_params = [{pipeline_mode = #tpu.pipeline_mode<synchronous>, transform_indices = @transform_0, window_bounds = array<i64: 8, 32>}, {pipeline_mode = #tpu.pipeline_mode<synchronous>, transform_indices = @transform_1, window_bounds = array<i64: 8, 1>}, {transform_indices = @transform_2, window_bounds = array<i64: 8, 32>}, {transform_indices = @transform_3, window_bounds = array<i64: 1, 8>}, {transform_indices = @transform_4, window_bounds = array<i64: 1, 8>}]} {
    %c0 = arith.constant 0 : index
    %c0_0 = arith.constant 0 : index
    %0 = vector.load %arg1[%c0, %c0_0] : memref<8x32xf32, #tpu.memory_space<vmem>>, vector<8x32xf32>
    %c0_1 = arith.constant 0 : index
    %c0_2 = arith.constant 0 : index
    %1 = vector.load %arg3[%c0_1, %c0_2] : memref<8x32xf32, #tpu.memory_space<vmem>>, vector<8x32xf32>
    %c0_3 = arith.constant 0 : index
    %c0_4 = arith.constant 0 : index
    %2 = vector.load %arg2[%c0_3, %c0_4] : memref<8x1xi32, #tpu.memory_space<vmem>>, vector<8x1xi32>
    %3 = arith.mulf %0, %0 : vector<8x32xf32>
    %cst = arith.constant dense<0.000000e+00> : vector<8xf32>
    %4 = vector.multi_reduction <add>, %3, %cst [1] : vector<8x32xf32> to vector<8xf32>
    %5 = vector.shape_cast %4 : vector<8xf32> to vector<8x1xf32>
    %6 = arith.mulf %1, %1 : vector<8x32xf32>
    %cst_5 = arith.constant dense<0.000000e+00> : vector<8xf32>
    %7 = vector.multi_reduction <add>, %6, %cst_5 [1] : vector<8x32xf32> to vector<8xf32>
    %8 = vector.shape_cast %7 : vector<8xf32> to vector<8x1xf32>
    %cst_6 = arith.constant dense<0.000000e+00> : vector<8x8xf32>
    %9 = tpu.matmul %0, %1, %cst_6 {dimension_numbers = #tpu.dot_dimension_numbers<[1], [1], [0], [0], [0, 0, 1, 0], [], []>} : vector<8x32xf32>, vector<8x32xf32>, vector<8x8xf32> -> vector<8x8xf32>
    %10 = tpu.transpose %8, [1, 0] : vector<8x1xf32> -> vector<1x8xf32>
    %11 = vector.broadcast %5 : vector<8x1xf32> to vector<8x8xf32>
    %12 = vector.broadcast %10 : vector<1x8xf32> to vector<8x8xf32>
    %13 = arith.addf %11, %12 : vector<8x8xf32>
    %cst_7 = arith.constant 2.000000e+00 : f32
    %14 = vector.broadcast %cst_7 : f32 to vector<8x8xf32>
    %15 = arith.mulf %14, %9 : vector<8x8xf32>
    %16 = arith.subf %13, %15 : vector<8x8xf32>
    %cst_8 = arith.constant 9.99999996E-13 : f32
    %cst_9 = arith.constant 9.99999995E+11 : f32
    %17 = vector.broadcast %cst_8 : f32 to vector<8x8xf32>
    %18 = arith.maximumf %17, %16 : vector<8x8xf32>
    %19 = vector.broadcast %cst_9 : f32 to vector<8x8xf32>
    %20 = arith.minimumf %19, %18 : vector<8x8xf32>
    %c8_i32 = arith.constant 8 : i32
    %21 = arith.muli %arg0, %c8_i32 : i32
    %22 = tpu.iota {dimensions = array<i32: 1>} : vector<8x8xi32>
    %23 = vector.broadcast %21 : i32 to vector<8x8xi32>
    %24 = arith.addi %23, %22 : vector<8x8xi32>
    %25 = vector.broadcast %2 : vector<8x1xi32> to vector<8x8xi32>
    %26 = arith.cmpi eq, %24, %25 : vector<8x8xi32>
    %27 = arith.extui %26 : vector<8x8xi1> to vector<8x8xi32>
    %cst_10 = arith.constant dense<0> : vector<8xi32>
    %28 = vector.multi_reduction <add>, %27, %cst_10 [0] : vector<8x8xi32> to vector<8xi32>
    %29 = vector.shape_cast %28 : vector<8xi32> to vector<1x8xi32>
    %c4_i32 = arith.constant 4 : i32
    %30 = vector.broadcast %c4_i32 : i32 to vector<1x8xi32>
    %31 = arith.cmpi eq, %29, %30 : vector<1x8xi32>
    %cst_11 = arith.constant -3.000000e+38 : f32
    %32 = vector.broadcast %cst_11 : f32 to vector<8x8xf32>
    %33 = arith.select %26, %20, %32 : vector<8x8xi1>, vector<8x8xf32>
    %cst_12 = arith.constant dense<0xFF800000> : vector<8xf32>
    %34 = vector.multi_reduction <maximumf>, %33, %cst_12 [0] : vector<8x8xf32> to vector<8xf32>
    %35 = vector.shape_cast %34 : vector<8xf32> to vector<1x8xf32>
    %cst_13 = arith.constant 3.000000e+38 : f32
    %36 = vector.broadcast %cst_13 : f32 to vector<8x8xf32>
    %37 = arith.select %26, %36, %20 : vector<8x8xi1>, vector<8x8xf32>
    %cst_14 = arith.constant dense<0x7F800000> : vector<8xf32>
    %38 = vector.multi_reduction <minimumf>, %37, %cst_14 [0] : vector<8x8xf32> to vector<8xf32>
    %39 = vector.shape_cast %38 : vector<8xf32> to vector<1x8xf32>
    %40 = arith.subf %35, %39 : vector<1x8xf32>
    %cst_15 = arith.constant 3.000000e-01 : f32
    %41 = vector.broadcast %cst_15 : f32 to vector<1x8xf32>
    %42 = arith.addf %40, %41 : vector<1x8xf32>
    %cst_16 = arith.constant 0.000000e+00 : f32
    %43 = vector.broadcast %cst_16 : f32 to vector<1x8xf32>
    %44 = arith.maximumf %42, %43 : vector<1x8xf32>
    %cst_17 = arith.constant 0.000000e+00 : f32
    %45 = vector.broadcast %cst_17 : f32 to vector<1x8xf32>
    %46 = arith.select %31, %44, %45 : vector<1x8xi1>, vector<1x8xf32>
    %c0_18 = arith.constant 0 : index
    %c0_19 = arith.constant 0 : index
    %47 = vector.load %arg4[%c0_18, %c0_19] : memref<1x8xf32, #tpu.memory_space<vmem>>, vector<1x8xf32>
    tpu.vector_store %arg4[%c0_18, %c0_19], %46 {strides = array<i32>} : memref<1x8xf32, #tpu.memory_space<vmem>>, vector<1x8xf32>,
    %48 = arith.extui %31 : vector<1x8xi1> to vector<1x8xi32>
    %49 = arith.sitofp %48 : vector<1x8xi32> to vector<1x8xf32>
    %c0_20 = arith.constant 0 : index
    %c0_21 = arith.constant 0 : index
    %50 = vector.load %arg5[%c0_20, %c0_21] : memref<1x8xf32, #tpu.memory_space<vmem>>, vector<1x8xf32>
    tpu.vector_store %arg5[%c0_20, %c0_21], %49 {strides = array<i32>} : memref<1x8xf32, #tpu.memory_space<vmem>>, vector<1x8xf32>,
    return
  }
  func.func @transform_0(%arg0: i32) -> (i32, i32) {
    %c0_i32 = arith.constant 0 : i32
    %c0_i32_0 = arith.constant 0 : i32
    %c0_i32_1 = arith.constant 0 : i32
    return %c0_i32, %c0_i32_0 : i32, i32
  }
  func.func @transform_1(%arg0: i32) -> (i32, i32) {
    %c0_i32 = arith.constant 0 : i32
    %c0_i32_0 = arith.constant 0 : i32
    %c0_i32_1 = arith.constant 0 : i32
    return %c0_i32, %c0_i32_0 : i32, i32
  }
  func.func @transform_2(%arg0: i32) -> (i32, i32) {
    %c0_i32 = arith.constant 0 : i32
    %c0_i32_0 = arith.constant 0 : i32
    return %arg0, %c0_i32 : i32, i32
  }
  func.func @transform_3(%arg0: i32) -> (i32, i32) {
    %c0_i32 = arith.constant 0 : i32
    %c0_i32_0 = arith.constant 0 : i32
    return %c0_i32, %arg0 : i32, i32
  }
  func.func @transform_4(%arg0: i32) -> (i32, i32) {
    %c0_i32 = arith.constant 0 : i32
    %c0_i32_0 = arith.constant 0 : i32
    return %c0_i32, %arg0 : i32, i32
  }
}

</mosaic_0001>

<bundles_post_ra>
// kernel: tpu_custom_call.1
= control target key start
LH: loop header
LB: loop body
LE: loop exit
PB: predicated region body
PF: predicated region fallthrough
CT: control target
= control target key end

     0   :  { %10 = vsyncpa [#allocation3], 0  ;;  %vm22_vm0 = vcmask 261120   ;;  %v284_v3 = vmov 0.0   ;;  %vm285_vm1 = vmmov 0   ;;  %s361_s0 = inlined_call_operand.vmem [shape: f32[8,32], index: 0, kind: input, shape index: {}]   ;;  %s362_s1 = inlined_call_operand.vmem [shape: s32[8,1], index: 1, kind: input, shape index: {}]   ;;  %s363_s2 = inlined_call_operand.vmem [shape: f32[8,32], index: 2, kind: input, shape index: {}]   ;;  %s364_s3 = inlined_call_operand.hbm [shape: f32[1,8], index: 3, kind: output, shape index: {0}]   ;;  %s365_s4 = inlined_call_operand.hbm [shape: f32[1,8], index: 4, kind: output, shape index: {1}]  }
   0x1   :  { %v19_v0 = vld [vmem:[%s363_s2] sm:$0xff]  ;;  %224 = vmatprep.subr.mxu0 %v284_v3  ;;  %226 = vmatprep.mubr.msk.f32.mxu0 %vm285_vm1, %v284_v3 }
   0x2   :  { %v18_v1 = vld [vmem:[%s361_s0] sm:$0xff]  ;;  %v26_v2 = vmul.f32 %v19_v0, %v19_v0 }
   0x3   :  { %v20_v4 = vld [vmem:[%s362_s1] sm:$0xff]  ;;  %v21_v5 = vmul.f32 %v18_v1, %v18_v1 }
   0x4   :  { %11 = vsyncpa [#allocation5], 0  ;;  %225 = vmatpush3.xpose.msk.msra.mxu0 %vm22_vm0, %v19_v0  ;;  %v286_v6 = vmov 0   ;;  %v27_v7 = vsel %vm22_vm0, %v26_v2, 0.0  ;;  %v138_v9 = vlaneseq  ;;  %vm157_vm2 = vcmask 64512   ;;  %s287_s0 = smov [#allocation4]  }
   0x5   :  { %234 = vset.pattern.permute.xlu1 %v286_v6  ;;  %235 = vset.pattern.permute.xlu0 %v286_v6  ;;  %v23_v8 = vsel %vm22_vm0, %v21_v5, 0.0  ;;  %vm186_vm4 = vcmask 57344   ;;  %s207_s1 = sshll.u32 %s287_s0, 4  ;;  %s208_s1 = int_to_ptr.vmem [resolvable:$true] %s207_s1 }
   0x6   :  { %153 = vperm.xlu1 %234, %v20_v4   ;;  %28 = vadd.xlane.f32.xlu0 %v27_v7  ;;  %v149_v10 = vand.u32 127, %v138_v9  ;;  %s236_s2 = scalar_lea.vmem %s208_s1, 16  ;;  %s240_s21 = scalar_lea.vmem %s208_s1, 32 }
   0x7   :  { %227 = vmatmul.mubr.msk.f32.vlgmr.msra.gmra.mrb[0].mxu0 %vm22_vm0, %v18_v1  ;;  %p237_p0 = scmp.ne.s32.totalorder %s208_s1, %s236_s2  ;;  %p241_p1 = scmp.lt.s32.totalorder %s208_s1, %s208_s1 }
   0x8   :  { %p242_p2 = scmp.lt.s32.totalorder %s240_s21, %s236_s2 }
   0xa   :  { %24 = vadd.xlane.f32.xlu0 %v23_v8  ;;  %p243_p3 = por %p242_p2, %p241_p1 }
   0xc   :  { %p244_p4 = pnand %p243_p3, %p237_p0 }
  0x85   :  { %v154_v11 = vpop.permute.xlu1 %153 }
  0x86   :  { %vm155_vm3 = vcmp.eq.s32.totalorder %v149_v10, %v154_v11 }
  0x87   :  { %v156_v12 = vsel %vm155_vm3, 1, %v286_v6 }
  0x88   :  { %v158_v13 = vsel %vm157_vm2, %v156_v12, 0 }
  0x89   :  { %v159_v14 = vrot.slane %v158_v13, 4 }
  0x8b   :  { %v160_v15 = vadd.s32 %v159_v14, %v158_v13 }
  0x8d   :  { %v161_v16 = vrot.slane %v160_v15, 2 }
  0x8f   :  { %v162_v17 = vadd.s32 %v161_v16, %v160_v15 }
  0x91   :  { %v163_v18 = vrot.slane %v162_v17, 1 }
  0x93   :  { %v164_v19 = vadd.s32 %v163_v18, %v162_v17  ;;  %v29_v20 = vpop.xlane.xlu0 %28 }
  0x94   :  { %106 = vxpose.xlu1.b32.start.end [1/1] (short) (narrow) %v29_v20, 8 }
  0x95   :  { %vm165_vm5 = vcmp.eq.s32.totalorder %v164_v19, 4 }
  0x96   :  { %v221_v21 = vsel %vm165_vm5, 1.0, %v284_v3 }
  0x97   :  { %190 = vst.msk [vmem:[#allocation4] sm:$0x1] %vm186_vm4, %v221_v21 }
  0x98   :  { %247 = shalt.err (!%p244_p4)
}
  0x99   :  { %s248_s24 = scalar_lea.hbm %s365_s4, 16 }
  0x9a   :  { %p249_p5 = scmp.ne.s32.totalorder %s365_s4, %s248_s24  ;;  %p252_p6 = scmp.lt.u32.totalorder %s248_s24, %s365_s4 }
  0x9c   :  { %p254_p7 = pnand %p252_p6, %p249_p5 }
  0x9e   :  { %257 = shalt.err (!%p254_p7)
}
  0x9f   :  { %210 = dma.vmem_to_hbm [thread:$0]  %s208_s1, 16, %s365_s4, [#allocation5]   ;;  %v139_v24 = vshrl.u32 %v138_v9, 7  ;;  %v25_v27 = vpop.xlane.xlu0 %24 }
  0xa0   :  { %s288_s4 = smov [#allocation2]  }
  0xa1   :  { %v140_v25 = vsub.s32 0, %v139_v24  ;;  %s197_s5 = sshll.u32 %s288_s4, 4  ;;  %s198_s5 = int_to_ptr.vmem [resolvable:$true] %s197_s5 }
  0xa2   :  { %s258_s6 = scalar_lea.vmem %s198_s5, 16  ;;  %s262_s7 = scalar_lea.vmem %s198_s5, 32 }
  0xa3   :  { %p259_p8 = scmp.ne.s32.totalorder %s198_s5, %s258_s6  ;;  %p263_p9 = scmp.lt.s32.totalorder %s198_s5, %s198_s5 }
  0xa4   :  { %p264_p10 = scmp.lt.s32.totalorder %s262_s7, %s258_s6 }
  0xa6   :  { %p265_p11 = por %p264_p10, %p263_p9 }
  0xa8   :  { %p266_p12 = pnand %p265_p11, %p259_p8 }
  0xda   :  { %v102_v22 = vpop.f32.mrb[0].mxu0 }
  0xdb   :  { %v228_v23 = vpop.f32.mrb[1].mxu0  ;;  %v143_v29 = vmul.f32 2.0, %v102_v22 }
 0x114   :  { %v122_v26 = vpop.trf.xlu1 }
 0x115   :  { %v141_v28 = vrot.slane %v122_v26, %v140_v25 }
 0x117   :  { %v142_v30 = vadd.f32 %v141_v28, %v25_v27 }
 0x119   :  { %v144_v31 = vsub.f32 %v142_v30, %v143_v29 }
 0x11b   :  { %v145_v32 = vmax.f32 %v144_v31, 1e-12 }
 0x11d   :  { %v146_v33 = vmin.f32 %v145_v32, 1e+12 }
 0x11f   :  { %v166_v34 = vsel %vm155_vm3, %v146_v33, -3e+38  ;;  %v174_v35 = vsel %vm155_vm3, 3e+38, %v146_v33 }
 0x120   :  { %v167_v36 = vsel %vm157_vm2, %v166_v34, -inf  ;;  %v175_v37 = vsel %vm157_vm2, %v174_v35, inf }
 0x121   :  { %v168_v38 = vrot.slane %v167_v36, 4  ;;  %v176_v39 = vrot.slane %v175_v37, 4 }
 0x123   :  { %v169_v40 = vmax.f32 %v167_v36, %v168_v38  ;;  %v177_v41 = vmin.f32 %v175_v37, %v176_v39 }
 0x125   :  { %v170_v42 = vrot.slane %v169_v40, 2  ;;  %v178_v43 = vrot.slane %v177_v41, 2 }
 0x127   :  { %v171_v44 = vmax.f32 %v169_v40, %v170_v42  ;;  %v179_v45 = vmin.f32 %v177_v41, %v178_v43 }
 0x129   :  { %v172_v46 = vrot.slane %v171_v44, 1  ;;  %v180_v47 = vrot.slane %v179_v45, 1 }
 0x12b   :  { %v173_v48 = vmax.f32 %v171_v44, %v172_v46  ;;  %v181_v49 = vmin.f32 %v179_v45, %v180_v47 }
 0x12d   :  { %v182_v50 = vsub.f32 %v173_v48, %v181_v49 }
 0x12f   :  { %v183_v51 = vadd.f32 0.3, %v182_v50 }
 0x131   :  { %v184_v52 = vmax.f32 %v183_v51, 0.0 }
 0x133   :  { %v185_v53 = vsel %vm165_vm5, %v184_v52, 0.0 }
 0x134   :  { %187 = vst.msk [vmem:[#allocation2] sm:$0x1] %vm186_vm4, %v185_v53 }
 0x135   :  { %269 = shalt.err (!%p266_p12)
}
 0x136   :  { %s270_s10 = scalar_lea.hbm %s364_s3, 16 }
 0x137   :  { %p271_p13 = scmp.ne.s32.totalorder %s364_s3, %s270_s10  ;;  %p274_p0 = scmp.lt.u32.totalorder %s270_s10, %s364_s3 }
 0x139   :  { %p276_p1 = pnand %p274_p0, %p271_p13 }
 0x13b   :  { %279 = shalt.err (!%p276_p1)
}
 0x13c   :  { %200 = dma.vmem_to_hbm [thread:$0]  %s198_s5, 16, %s364_s3, [#allocation3]  }
 0x13d   :  { %280 = dma.done.wait [#allocation3], 16  }
 0x13e   :  { %281 = vsyncadd [#allocation3], 4294967280 }
 0x13f   :  { %282 = dma.done.wait [#allocation5], 16  }
 0x140   :  { %283 = vsyncadd [#allocation5], 4294967280 }
 0x141   :  { %217 = vsyncpa [#allocation3], 1 }
 0x142   :  { %218 = vsyncpa [#allocation5], 1 }

</bundles_post_ra>
